<compile_context>
chip_gen: v6e
topology: v6e:2x2x1
jax: 0.10.0
libtpu: 0.0.40
codegen_flags: <defaults>
</compile_context>

<pallas_src>
import jax
import jax.numpy as jnp
import numpy as np
from jax.experimental import pallas as pl
from jax.experimental.pallas import tpu as pltpu


def _bilinear_matrix(out_size: int, in_size: int) -> np.ndarray:
    """Row-stochastic (out_size, in_size) operator matching torch bilinear
    upsampling with align_corners=False along one axis."""
    scale = in_size / out_size
    i = np.arange(out_size, dtype=np.float64)
    src = (i + 0.5) * scale - 0.5
    src = np.maximum(src, 0.0)                    # torch clamps the lower bound
    i0 = np.floor(src).astype(np.int64)
    i0 = np.minimum(i0, in_size - 1)
    i1 = np.minimum(i0 + 1, in_size - 1)
    frac = src - i0
    M = np.zeros((out_size, in_size), dtype=np.float64)
    M[np.arange(out_size), i0] += (1.0 - frac)
    M[np.arange(out_size), i1] += frac
    return M


def _modulation_kernel(x1_ref, x2_ref, w1_ref, w2_ref, kront_ref, b_ref, o_ref):
    # x1_ref   : (Bb, C, HW)     channel-major RGB features
    # x2_ref   : (Bb, C, h2*w2)  channel-major salience features (small)
    # w1_ref   : (C, C)          1x1-conv weight slice acting on x1 channels
    # w2_ref   : (C, C)          1x1-conv weight slice acting on x2 channels
    # kront_ref: (h2*w2, HW)     kron(Wh, Ww)^T bilinear-upsample operator
    # b_ref    : (C, 1)          bias (f32)
    # o_ref    : (Bb, C, HW)     output (lane-dense: HW on lanes)
    bb = x1_ref.shape[0]
    for b in range(bb):                                   # tiny static batch block
        # 1x1 conv on the small salience map, then upsample the conv'ed result
        y2 = jnp.dot(w2_ref[...], x2_ref[b],
                     preferred_element_type=jnp.float32)  # (C, h2*w2)
        up = jnp.dot(y2.astype(kront_ref.dtype), kront_ref[...],
                     preferred_element_type=jnp.float32)  # (C, HW)
        # 1x1 conv on the RGB features (lane-dense main matmul)
        y1 = jnp.dot(w1_ref[...], x1_ref[b],
                     preferred_element_type=jnp.float32)  # (C, HW)
        o_ref[b] = (y1 + up + b_ref[...]).astype(o_ref.dtype)


def feature_pyramids_modulation(x1_nchw, x2_nchw, conv_weight, conv_bias,
                                *, compute_dtype=None, batch_block=1):
    """x1_nchw: (N, C, H, W); x2_nchw: (N, C, h2, w2);
       conv_weight: (C, 2C, 1, 1); conv_bias: (C,).
       Returns (N, C, H, W) in x1's dtype.
       compute_dtype: dtype of the matmul operands (e.g. jnp.bfloat16);
       accumulation is always f32.  batch_block: batch elements per grid step."""
    N, C, H, W = x1_nchw.shape
    _, _, h2, w2 = x2_nchw.shape
    HW, S2 = H * W, h2 * w2
    assert N % batch_block == 0, "batch_block must divide N"

    out_dtype = x1_nchw.dtype
    if compute_dtype is None:
        compute_dtype = x1_nchw.dtype

    # Separable bilinear operators fused into the (small) transposed kron op.
    Wh = _bilinear_matrix(H, h2)                                  # (H, h2)
    Ww = _bilinear_matrix(W, w2)                                  # (W, w2)
    kront = jnp.asarray(np.kron(Wh, Ww).T, dtype=compute_dtype)   # (h2*w2, HW)

    # Conv/upsample commute: Wcat = [W1 | W2] over Conv2d's concat channel order.
    Wcat = conv_weight[:, :, 0, 0]                                # (C, 2C)
    W1 = Wcat[:, :C].astype(compute_dtype)                        # (C, C) for x1
    W2 = Wcat[:, C:].astype(compute_dtype)                        # (C, C) for x2
    bias = conv_bias.reshape(C, 1).astype(jnp.float32)            # (C, 1)

    # Channel-major views: pure reshapes, no transposes of the big tensors.
    x1_f = x1_nchw.reshape(N, C, HW).astype(compute_dtype)        # (N, C, HW)
    x2_f = x2_nchw.reshape(N, C, S2).astype(compute_dtype)        # (N, C, h2*w2)

    grid = (N // batch_block,)
    out_f = pl.pallas_call(
        _modulation_kernel,
        out_shape=jax.ShapeDtypeStruct((N, C, HW), out_dtype),
        grid=grid,
        in_specs=[
            pl.BlockSpec((batch_block, C, HW), lambda n: (n, 0, 0)),   # x1
            pl.BlockSpec((batch_block, C, S2), lambda n: (n, 0, 0)),   # x2
            pl.BlockSpec((C, C), lambda n: (0, 0)),                    # W1
            pl.BlockSpec((C, C), lambda n: (0, 0)),                    # W2
            pl.BlockSpec((S2, HW), lambda n: (0, 0)),                  # kron^T
            pl.BlockSpec((C, 1), lambda n: (0, 0)),                    # bias
        ],
        out_specs=pl.BlockSpec((batch_block, C, HW), lambda n: (n, 0, 0)),
        compiler_params=pltpu.CompilerParams(
            dimension_semantics=("parallel",),
        ),
    )(x1_f, x2_f, W1, W2, kront, bias)

    # (N, C, HW) -> NCHW is a pure reshape: no output transpose.
    return out_f.reshape(N, C, H, W)


if __name__ == "__main__":
    key = jax.random.PRNGKey(0)
    k1, k2, k3, k4 = jax.random.split(key, 4)

    # Small, forward-consistent shapes: embedd_dim = (C, H, W) = (32, 16, 16),
    # salience features x2 at lower spatial resolution (8, 8).
    N, C, H, W = 2, 32, 16, 16
    h2, w2 = 8, 8

    x1 = jax.random.normal(k1, (N, C, H, W), dtype=jnp.float32)
    x2 = jax.random.normal(k2, (N, C, h2, w2), dtype=jnp.float32)

    # Deterministic synthetic conv parameters (Conv2d(2C, C, 1)).
    conv_weight = 0.05 * jax.random.normal(k3, (C, 2 * C, 1, 1), dtype=jnp.float32)
    conv_bias = 0.1 * jax.random.normal(k4, (C,), dtype=jnp.float32)

    # Pure-JAX reference (upsample -> concat -> 1x1 conv), all f32.
    Wh = jnp.asarray(_bilinear_matrix(H, h2), dtype=jnp.float32)
    Ww = jnp.asarray(_bilinear_matrix(W, w2), dtype=jnp.float32)
    up_ref = jnp.einsum('hi,wj,ncij->nchw', Wh, Ww, x2)
    cat = jnp.concatenate([x1, up_ref], axis=1)
    ref = (jnp.einsum('oc,nchw->nohw', conv_weight[:, :, 0, 0], cat)
           + conv_bias[None, :, None, None])

    # f32 compute path (tight check); grid=(2,) -> two parallel steps.
    out_f32 = feature_pyramids_modulation(x1, x2, conv_weight, conv_bias,
                                          compute_dtype=jnp.float32,
                                          batch_block=1)
    out_f32 = jax.block_until_ready(out_f32)
    assert out_f32.shape == (N, C, H, W)
    np.testing.assert_allclose(np.asarray(out_f32), np.asarray(ref),
                               rtol=1e-4, atol=1e-4)

    # bf16 compute path (HBM/MXU-optimized) with a batch-blocked grid step.
    out_bf16 = feature_pyramids_modulation(x1, x2, conv_weight, conv_bias,
                                           compute_dtype=jnp.bfloat16,
                                           batch_block=2)
    out_bf16 = jax.block_until_ready(out_bf16)
    assert out_bf16.shape == (N, C, H, W)
    np.testing.assert_allclose(np.asarray(out_bf16), np.asarray(ref),
                               rtol=5e-2, atol=5e-2)

    print("KERNEL_OK")
</pallas_src>

<mosaic_0001>
module attributes {stable_mosaic.version = 11 : i64} {
  func.func @_modulation_kernel(%arg0: i32, %arg1: memref<1x32x256xf32, #tpu.memory_space<vmem>>, %arg2: memref<1x32x64xf32, #tpu.memory_space<vmem>>, %arg3: memref<32x32xf32, #tpu.memory_space<vmem>>, %arg4: memref<32x32xf32, #tpu.memory_space<vmem>>, %arg5: memref<64x256xf32, #tpu.memory_space<vmem>>, %arg6: memref<32x1xf32, #tpu.memory_space<vmem>>, %arg7: memref<1x32x256xf32, #tpu.memory_space<vmem>>) attributes {dimension_semantics = [#tpu.dimension_semantics<parallel>], iteration_bounds = array<i64: 2>, scalar_prefetch = 0 : i64, scratch_operands = 0 : i64, tpu.core_type = #tpu.core_type<tc>, window_params = [{transform_indices = @transform_0, window_bounds = array<i64: 1, 32, 256>}, {transform_indices = @transform_1, window_bounds = array<i64: 1, 32, 64>}, {pipeline_mode = #tpu.pipeline_mode<synchronous>, transform_indices = @transform_2, window_bounds = array<i64: 32, 32>}, {pipeline_mode = #tpu.pipeline_mode<synchronous>, transform_indices = @transform_3, window_bounds = array<i64: 32, 32>}, {pipeline_mode = #tpu.pipeline_mode<synchronous>, transform_indices = @transform_4, window_bounds = array<i64: 64, 256>}, {pipeline_mode = #tpu.pipeline_mode<synchronous>, transform_indices = @transform_5, window_bounds = array<i64: 32, 1>}, {transform_indices = @transform_6, window_bounds = array<i64: 1, 32, 256>}]} {
    %c0 = arith.constant 0 : index
    %c0_0 = arith.constant 0 : index
    %0 = vector.load %arg4[%c0, %c0_0] : memref<32x32xf32, #tpu.memory_space<vmem>>, vector<32x32xf32>
    %c0_1 = arith.constant 0 : index
    %c0_2 = arith.constant 0 : index
    %c0_3 = arith.constant 0 : index
    %1 = vector.load %arg2[%c0_1, %c0_2, %c0_3] : memref<1x32x64xf32, #tpu.memory_space<vmem>>, vector<1x32x64xf32>
    %2 = vector.shape_cast %1 : vector<1x32x64xf32> to vector<32x64xf32>
    %cst = arith.constant dense<0.000000e+00> : vector<32x64xf32>
    %3 = tpu.matmul %0, %2, %cst {dimension_numbers = #tpu.dot_dimension_numbers<[1], [0], [0], [1], [0, 0, 1, 1], [], []>} : vector<32x32xf32>, vector<32x64xf32>, vector<32x64xf32> -> vector<32x64xf32>
    %c0_4 = arith.constant 0 : index
    %c0_5 = arith.constant 0 : index
    %4 = vector.load %arg5[%c0_4, %c0_5] : memref<64x256xf32, #tpu.memory_space<vmem>>, vector<64x256xf32>
    %cst_6 = arith.constant dense<0.000000e+00> : vector<32x256xf32>
    %5 = tpu.matmul %3, %4, %cst_6 {dimension_numbers = #tpu.dot_dimension_numbers<[1], [0], [0], [1], [0, 0, 1, 1], [], []>} : vector<32x64xf32>, vector<64x256xf32>, vector<32x256xf32> -> vector<32x256xf32>
    %c0_7 = arith.constant 0 : index
    %c0_8 = arith.constant 0 : index
    %6 = vector.load %arg3[%c0_7, %c0_8] : memref<32x32xf32, #tpu.memory_space<vmem>>, vector<32x32xf32>
    %c0_9 = arith.constant 0 : index
    %c0_10 = arith.constant 0 : index
    %c0_11 = arith.constant 0 : index
    %7 = vector.load %arg1[%c0_9, %c0_10, %c0_11] : memref<1x32x256xf32, #tpu.memory_space<vmem>>, vector<1x32x256xf32>
    %8 = vector.shape_cast %7 : vector<1x32x256xf32> to vector<32x256xf32>
    %cst_12 = arith.constant dense<0.000000e+00> : vector<32x256xf32>
    %9 = tpu.matmul %6, %8, %cst_12 {dimension_numbers = #tpu.dot_dimension_numbers<[1], [0], [0], [1], [0, 0, 1, 1], [], []>} : vector<32x32xf32>, vector<32x256xf32>, vector<32x256xf32> -> vector<32x256xf32>
    %10 = arith.addf %9, %5 : vector<32x256xf32>
    %c0_13 = arith.constant 0 : index
    %c0_14 = arith.constant 0 : index
    %11 = vector.load %arg6[%c0_13, %c0_14] : memref<32x1xf32, #tpu.memory_space<vmem>>, vector<32x1xf32>
    %12 = vector.broadcast %11 : vector<32x1xf32> to vector<32x256xf32>
    %13 = arith.addf %10, %12 : vector<32x256xf32>
    %c0_15 = arith.constant 0 : index
    %c0_16 = arith.constant 0 : index
    %c0_17 = arith.constant 0 : index
    %14 = vector.load %arg7[%c0_15, %c0_16, %c0_17] : memref<1x32x256xf32, #tpu.memory_space<vmem>>, vector<1x32x256xf32>
    %15 = vector.shape_cast %14 : vector<1x32x256xf32> to vector<32x256xf32>
    %16 = vector.shape_cast %13 : vector<32x256xf32> to vector<1x32x256xf32>
    tpu.vector_store %arg7[%c0_15, %c0_16, %c0_17], %16 {strides = array<i32>} : memref<1x32x256xf32, #tpu.memory_space<vmem>>, vector<1x32x256xf32>,
    return
  }
  func.func @transform_0(%arg0: i32) -> (i32, i32, i32) {
    %c0_i32 = arith.constant 0 : i32
    %c0_i32_0 = arith.constant 0 : i32
    %c0_i32_1 = arith.constant 0 : i32
    return %arg0, %c0_i32, %c0_i32_0 : i32, i32, i32
  }
  func.func @transform_1(%arg0: i32) -> (i32, i32, i32) {
    %c0_i32 = arith.constant 0 : i32
    %c0_i32_0 = arith.constant 0 : i32
    %c0_i32_1 = arith.constant 0 : i32
    return %arg0, %c0_i32, %c0_i32_0 : i32, i32, i32
  }
  func.func @transform_2(%arg0: i32) -> (i32, i32) {
    %c0_i32 = arith.constant 0 : i32
    %c0_i32_0 = arith.constant 0 : i32
    %c0_i32_1 = arith.constant 0 : i32
    return %c0_i32, %c0_i32_0 : i32, i32
  }
  func.func @transform_3(%arg0: i32) -> (i32, i32) {
    %c0_i32 = arith.constant 0 : i32
    %c0_i32_0 = arith.constant 0 : i32
    %c0_i32_1 = arith.constant 0 : i32
    return %c0_i32, %c0_i32_0 : i32, i32
  }
  func.func @transform_4(%arg0: i32) -> (i32, i32) {
    %c0_i32 = arith.constant 0 : i32
    %c0_i32_0 = arith.constant 0 : i32
    %c0_i32_1 = arith.constant 0 : i32
    return %c0_i32, %c0_i32_0 : i32, i32
  }
  func.func @transform_5(%arg0: i32) -> (i32, i32) {
    %c0_i32 = arith.constant 0 : i32
    %c0_i32_0 = arith.constant 0 : i32
    %c0_i32_1 = arith.constant 0 : i32
    return %c0_i32, %c0_i32_0 : i32, i32
  }
  func.func @transform_6(%arg0: i32) -> (i32, i32, i32) {
    %c0_i32 = arith.constant 0 : i32
    %c0_i32_0 = arith.constant 0 : i32
    %c0_i32_1 = arith.constant 0 : i32
    return %arg0, %c0_i32, %c0_i32_0 : i32, i32, i32
  }
}

</mosaic_0001>

<bundles_post_ra>
// kernel: tpu_custom_call.1
= control target key start
LH: loop header
LB: loop body
LE: loop exit
PB: predicated region body
PF: predicated region fallthrough
CT: control target
= control target key end

     0   :  { %s1532_s0 = inlined_call_operand.hbm [shape: f32[2,32,256], index: 0, kind: input, shape index: {}]   ;;  %s1533_s1 = inlined_call_operand.hbm [shape: f32[2,32,64], index: 1, kind: input, shape index: {}]   ;;  %s1534_s2 = inlined_call_operand.vmem [shape: f32[32,32], index: 2, kind: input, shape index: {}]   ;;  %s1535_s3 = inlined_call_operand.hbm [shape: f32[32,32], index: 3, kind: input, shape index: {}]   ;;  %s1536_s4 = inlined_call_operand.hbm [shape: f32[64,256], index: 4, kind: input, shape index: {}]   ;;  %s1537_s5 = inlined_call_operand.vmem [shape: f32[32,1], index: 5, kind: input, shape index: {}]   ;;  %s1538_s6 = inlined_call_operand.hbm [shape: f32[2,32,256], index: 6, kind: output, shape index: {}]  }
   0x1   :  { %1546 = sst [smem:[#allocation17_spill]] %s1532_s0 }
   0x2   :  { %1547 = sst [smem:[#allocation18_spill]] %s1535_s3 }
   0x3   :  { %1548 = sst [smem:[#allocation19_spill]] %s1536_s4 }
   0x4   :  { %11 = vsyncpa [#allocation3], 0 }
   0x5   :  { %13 = vsyncpa [#allocation3 + $0x1], 0 }
   0x6   :  { %14 = vsyncpa [#allocation6], 0 }
   0x7   :  { %16 = vsyncpa [#allocation6 + $0x1], 0 }
   0x8   :  { %17 = vsyncpa [#allocation9], 0 }
   0x9   :  { %18 = vsyncpa [#allocation4], 0 }
   0xa   :  { %20 = vsyncpa [#allocation4 + $0x1], 0  ;;  %s1220_s21 = smov 0   ;;  %s1222_s22 = smov 0  }
   0xb   :  { %s1224_s23 = smov 0   ;;  %s1226_s24 = smov 0  }
   0xc LB: > { %s1241_s25 = sadd.s32 4294967295, %s1170_s24   ;;  %s845_s26 = sadd.s32 4294967294, %s1170_s24   ;;  %s1170_s24 = sphi %s1226_s24, %s1577_s24   ;;  %s1166_s23 = sphi %s1224_s23, %s1576_s23   ;;  %s1162_s22 = sphi %s1222_s22, %s1575_s22   ;;  %s1158_s21 = sphi %s1220_s21, %s1574_s21  }
   0xd   : > { %p46_p0 = scmp.ne.s32.totalorder %s1162_s22, %s1158_s21  ;;  %p1543_p1 = scmp.eq.s32.totalorder %s1241_s25, 0 }
   0xe   : > { %p180_p2 = scmp.eq.s32.totalorder %s1241_s25, 1  ;;  %p186_p3 = scmp.eq.s32.totalorder %s845_s26, 1 }
   0xf   : > { %p1250_p4 = por %p1543_p1, %p46_p0  ;;  %p846_p5 = scmp.ge.s32.totalorder %s1170_s24, 1 }
  0x10   : > { %p1255_p6 = por %p186_p3, %p46_p0  ;;  %p193_p7 = scmp.lt.s32.totalorder %s1170_s24, 3 }
  0x11   : > { %s1549_s27 = scalar_select %p1250_p4, 1, 0 }
  0x12   : > { %s1550_s28 = scalar_select %p1255_p6, 1, 0 }
  0x13   : > { %p1260_p8 = pnand %p846_p5, %p193_p7  ;;  %s1172_s30 = smov [#allocation7]  }
  0x14   : > { %s208_s7 = sshll.u32 %s1172_s30, 4  ;;  %s1173_s9 = smov [#allocation8]   ;;  %s209_s7 = int_to_ptr.vmem [resolvable:$true] %s208_s7 }
  0x15   : > { %p918_p9 = pneg %p1260_p8  ;;  %s221_s10 = sshll.u32 %s1173_s9, 4  ;;  %s222_s10 = int_to_ptr.vmem [resolvable:$true] %s221_s10 }
  0x16   : > { %s997_s11 = scalar_lea.vmem %s209_s7, 512  ;;  %p1005_p5 = scmp.lt.s32.totalorder %s209_s7, %s209_s7 }
  0x17   : > { %p1269_p11 = pnand %p918_p9, %p1543_p1  ;;  %p998_p13 = scmp.ne.s32.totalorder %s209_s7, %s997_s11 }
  0x18   : > { %p1006_p7 = scmp.lt.s32.totalorder %s997_s11, %s997_s11 }
  0x19   : > { %p988_p12 = pneg %p1269_p11 }
  0x1a   : > { %p1007_p10 = por %p1006_p7, %p1005_p5 }
  0x1b   : > { %p1000_p0 = pnand %p998_p13, %p988_p12 }
  0x1d   : > { %p1001_p3 = pneg %p1000_p0 }
  0x1f   : > { %p1008_p9 = pnand %p1007_p10, %p1001_p3 }
  0x21   : > { %1011 = shalt.err (!%p1008_p9)
}
  0x22   : > { %s1539_s12 = smov 128   ;;  %s1540_s13 = smov 8  }
  0x23   : > { %s1553_s3 = sld [smem:[#allocation18_spill]]  ;;  %s1023_s16 = scalar_lea.vmem %s222_s10, 2048 }
  0x24   : > { %p1024_p13 = scmp.ne.s32.totalorder %s222_s10, %s1023_s16  ;;  %p1031_p10 = scmp.lt.s32.totalorder %s222_s10, %s222_s10 }
  0x25   : > { %p1032_p3 = scmp.lt.s32.totalorder %s1023_s16, %s1023_s16 }
  0x26   : > { %p1026_p0 = pnand %p1024_p13, %p988_p12 }
  0x27   : > { %p1033_p7 = por %p1032_p3, %p1031_p10 }
  0x28   : > { %p1027_p5 = pneg %p1026_p0 }
  0x29   : > { %921 = dma.hbm_to_vmem [thread:$0]  (!%p1269_p11), %s1553_s3, 512, %s209_s7, [#allocation6], %s1539_s12, %s1539_s12, %s1540_s13  }
  0x2a   : > { %p1034_p9 = pnand %p1033_p7, %p1027_p5 }
  0x2c   : > { %1037 = shalt.err (!%p1034_p9)
}
  0x2d   : > { %s1541_s17 = smov 256   ;;  %s1542_s18 = smov 16  }
  0x2e   : > { %s1554_s4 = sld [smem:[#allocation19_spill]]  ;;  %s1298_s26 = sadd.s32 1, %s1170_s24  }
  0x2f   : > { %s30_s30 = ssub.s32 %s1170_s24, %s1298_s26  ;;  %s33_s7 = sadd.s32 1, %s1166_s23 }
  0x30   : > { %p31_p12 = scmp.eq.s32.totalorder %s30_s30, 0  ;;  %p40_p13 = scmp.ne.s32.totalorder %s1166_s23, %s1162_s22 }
  0x31   : > { %p41_p0 = scmp.eq.s32.totalorder %s1170_s24, 0  ;;  %p938_p3 = scmp.lt.s32.totalorder %s1170_s24, 2 }
  0x32   : > { %s1307_s9 = scalar_select %p31_p12, %s1166_s23, %s33_s7  }
  0x33   : > { %p42_p5 = por %p41_p0, %p40_p13  ;;  %p1311_p10 = por %p180_p2, %p40_p13 }
  0x34   : > { %924 = dma.hbm_to_vmem [thread:$0]  (!%p1269_p11), %s1554_s4, 2048, %s222_s10, [#allocation9], %s1541_s17, %s1541_s17, %s1542_s18  }
  0x35   : > { %1555 = sst [smem:[#allocation16_spill]] %s1307_s9  ;;  %s1317_s11 = sand.u32 1, %s1166_s23  }
  0x36   : > { %s1556_s8 = scalar_select %p1311_p10, 1, 0 }
  0x37   : > { %s850_s10 = sshll.u32 %s1317_s11, 6  ;;  %s879_s14 = sshll.u32 %s1170_s24, 10 }
  0x38   : > { %s1557_s0 = sld [smem:[#allocation17_spill]]  ;;  %s242_s20 = scalar_lea.vmem [#allocation2], %s850_s10 }
  0x39   : > { %s249_s30 = sshll.u32 %s242_s20, 4  ;;  %p1328_p2 = pnand %p938_p3, %p42_p5  ;;  %s1326_s30 = int_to_ptr.vmem [resolvable:$true] %s249_s30 }
  0x3a   : > { %s239_s17 = scalar_lea.sflag [#allocation3], %s1317_s11 }
  0x3b   : > { %p1040_p7 = pneg %p1328_p2 }
  0x3e   : > { %s1324_s19 = scalar_lea.hbm %s1557_s0, %s879_s14  ;;  %s1043_s15 = scalar_lea.hbm %s1557_s0, 2048 }
  0x3f   : > { %s1038_s18 = scalar_lea.hbm %s1324_s19, 1024  ;;  %p1044_p13 = scmp.lt.s32.totalorder %s1324_s19, %s1557_s0 }
  0x40   : > { %p1039_p11 = scmp.ne.s32.totalorder %s1324_s19, %s1038_s18  ;;  %p1045_p0 = scmp.lt.s32.totalorder %s1043_s15, %s1038_s18 }
  0x42   : > { %p1041_p9 = pnand %p1040_p7, %p1039_p11  ;;  %p1046_p5 = por %p1045_p0, %p1044_p13 }
  0x44   : > { %p1042_p12 = pneg %p1041_p9 }
  0x46   : > { %p1047_p3 = pnand %p1046_p5, %p1042_p12 }
  0x48   : > { %1050 = shalt.err (!%p1047_p3)
}
  0x49   : > { %s1051_s12 = scalar_lea.vmem %s1326_s30, 1024  ;;  %s1178_s10 = smov [#allocation2]  }
  0x4a   : > { %p1052_p1 = scmp.ne.s32.totalorder %s1326_s30, %s1051_s12  ;;  %s1056_s14 = sshll.u32 %s1178_s10, 4  ;;  %s1057_s14 = int_to_ptr.vmem [resolvable:$false] %s1056_s14 }
  0x4b   : > { %s1058_s13 = scalar_lea.vmem %s1057_s14, 2048  ;;  %p1059_p6 = scmp.lt.s32.totalorder %s1326_s30, %s1057_s14 }
  0x4c   : > { %p1054_p11 = pnand %p1052_p1, %p1040_p7  ;;  %p1060_p10 = scmp.lt.s32.totalorder %s1058_s13, %s1051_s12 }
  0x4e   : > { %p1055_p9 = pneg %p1054_p11  ;;  %p1061_p4 = por %p1060_p10, %p1059_p6 }
  0x50   : > { %p1062_p13 = pnand %p1061_p4, %p1055_p9 }
  0x52   : > { %1065 = shalt.err (!%p1062_p13)
}
  0x53   : > { %s1559_s18 = smov 16   ;;  %s1560_s15 = smov 256  }
  0x54   : > { %928 = dma.hbm_to_vmem [thread:$0]  (!%p1328_p2), %s1324_s19, 1024, %s1326_s30, %s239_s17, %s1560_s15, %s1560_s15, %s1559_s18  }
  0x55   : > { %s880_s16 = sshll.u32 %s1170_s24, 9  ;;  %s1561_s10 = sshll.u32 %s1317_s11, 5 }
  0x56   : > { %s1368_s13 = scalar_lea.hbm %s1533_s1, %s880_s16  ;;  %s263_s14 = scalar_lea.vmem [#allocation5], %s1561_s10 }
  0x57   : > { %s270_s0 = sshll.u32 %s263_s14, 4  ;;  %s1562_s3 = sand.u32 1, %s1170_s24   ;;  %s1372_s0 = int_to_ptr.vmem [resolvable:$true] %s270_s0 }
  0x58   : > { %s260_s4 = scalar_lea.sflag [#allocation6], %s1562_s3  ;;  %s1066_s9 = scalar_lea.hbm %s1368_s13, 512 }
  0x59   : > { %p1067_p1 = scmp.ne.s32.totalorder %s1368_s13, %s1066_s9  ;;  %s1071_s30 = scalar_lea.hbm %s1533_s1, 1024 }
  0x5a   : > { %p1072_p10 = scmp.lt.s32.totalorder %s1368_s13, %s1533_s1  ;;  %p1073_p12 = scmp.lt.s32.totalorder %s1071_s30, %s1066_s9 }
  0x5b   : > { %p1069_p4 = pnand %p1067_p1, %p1040_p7 }
  0x5c   : > { %p1074_p0 = por %p1073_p12, %p1072_p10 }
  0x5d   : > { %p1070_p6 = pneg %p1069_p4 }
  0x5f   : > { %p1075_p5 = pnand %p1074_p0, %p1070_p6 }
  0x61   : > { %1078 = shalt.err (!%p1075_p5)
}
  0x62   : > { %s1079_s3 = scalar_lea.vmem %s1372_s0, 512  ;;  %s1179_s15 = smov [#allocation5]  }
  0x63   : > { %p1080_p3 = scmp.ne.s32.totalorder %s1372_s0, %s1079_s3  ;;  %s1084_s16 = sshll.u32 %s1179_s15, 4  ;;  %s1085_s16 = int_to_ptr.vmem [resolvable:$false] %s1084_s16 }
  0x64   : > { %s1086_s20 = scalar_lea.vmem %s1085_s16, 1024  ;;  %p1087_p13 = scmp.lt.s32.totalorder %s1372_s0, %s1085_s16 }
  0x65   : > { %p1082_p11 = pnand %p1080_p3, %p1040_p7  ;;  %p1088_p1 = scmp.lt.s32.totalorder %s1086_s20, %s1079_s3 }
  0x67   : > { %p1083_p9 = pneg %p1082_p11  ;;  %p1089_p4 = por %p1088_p1, %p1087_p13 }
  0x69   : > { %p1090_p10 = pnand %p1089_p4, %p1083_p9 }
  0x6b   : > { %1093 = shalt.err (!%p1090_p10)
}
  0x6c   : > { %s1563_s9 = smov 8   ;;  %s1564_s12 = smov 128  }
  0x6d   : > { %931 = dma.hbm_to_vmem [thread:$0]  (!%p1328_p2), %s1368_s13, 512, %s1372_s0, %s260_s4, %s1564_s12, %s1564_s12, %s1563_s9  }
  0x6e   : > { %282 = sbr.rel (%p1260_p8) target bundleno = 555 (0x22b), region = 44  ;;  %s1404_s10 = sand.u32 (!%p1260_p8), 1, %s1162_s22  }
  0x6f   : > { %s857_s14 = sshll.u32 (!%p1260_p8), %s1404_s10, 6  ;;  %s285_s17 = scalar_lea.sflag (!%p1260_p8), [#allocation3], %s1404_s10 }
  0x70   : > { %s1410_s7 = scalar_lea.vmem (!%p1260_p8), [#allocation2], %s857_s14  ;;  %p1565_p7 = scmp.ne.s32.totalorder (!%p1260_p8), %s1549_s27, 0 }
  0x73   : > { %1137 = dma.done.wait (%p1565_p7), %s285_s17, 1024  }
  0x74   : > { %1139 = vsyncadd (%p1565_p7), %s285_s17, 4294966272  ;;  %s293_s0 = sand.u32 1, %s1241_s25   ;;  %s858_s4 = sshll.u32 %s1404_s10, 5 }
  0x75   : > { %s294_s29 = scalar_lea.sflag [#allocation6], %s293_s0  ;;  %s297_s13 = scalar_lea.vmem [#allocation5], %s858_s4 }
  0x76   : > { %1141 = dma.done.wait (%p1565_p7), %s294_s29, 512  }
  0x77   : > { %1143 = vsyncadd (%p1565_p7), %s294_s29, 4294966784  ;;  %p1566_p8 = scmp.eq.s32.totalorder %s1241_s25, 0 }
  0x79   : > { %1145 = dma.done.wait (%p1566_p8), [#allocation6], 512   ;;  %p1567_p2 = pmov %p1566_p8 }
  0x7b   : > { %1147 = vsyncadd (%p1567_p2), [#allocation6], 4294966784  ;;  %p1568_p6 = pmov %p1567_p2 }
  0x7c   : > { %p1569_p12 = pmov %p1567_p2 }
  0x7d   : > { %1149 = dma.done.wait (%p1568_p6), [#allocation9], 2048  }
  0x7e   : > { %1151 = vsyncadd (%p1569_p12), [#allocation9], 4294965248  ;;  %vm347_vm0 = vcmask 261120   ;;  %v346_v0 = vld [vmem:[%s297_s13 + $0x18] sm:$0xff]  ;;  %v345_v1 = vld [vmem:[%s297_s13 + $0x10] sm:$0xff]  ;;  %v1180_v32 = vmov 0.0  }
  0x7f   : > { %890 = vmatprep.subr.mxu0 %v346_v0  ;;  %v339_v2 = vld [vmem:[#allocation7] sm:$0xff]  ;;  %v344_v3 = vld [vmem:[%s297_s13 + $0x8] sm:$0xff]  ;;  %v460_v4 = vld [vmem:[#allocation8 + $0x78] sm:$0xff]  ;;  %538 = vmatprep.mubr.f32.mxu1 %v1180_v32  ;;  %v1181_v39 = vmov 0   ;;  %vm461_vm1 = vcmask 523264   ;;  %s881_s27 = sshll.u32 %s1241_s25, 10 }
  0x80   : > { %891 = vmatpush3.msra.mxu0 %v346_v0  ;;  %898 = vmatprep.mubr.msk.f32.mxu0 %vm347_vm0, %v339_v2  ;;  %v459_v5 = vld [vmem:[#allocation8 + $0x70] sm:$0xff]  ;;  %v458_v6 = vld [vmem:[#allocation8 + $0x68] sm:$0xff]  ;;  %v457_v7 = vld [vmem:[#allocation8 + $0x60] sm:$0xff]  ;;  %s1487_s11 = scalar_lea.hbm %s1538_s6, %s881_s27  ;;  %s717_s18 = scalar_lea.sflag [#allocation4], %s1404_s10 }
  0x81   : > { %892 = vmatprep.subr.mxu0 %v345_v1  ;;  %490 = vmatprep.subr.mxu1 %v460_v4  ;;  %v343_v8 = vld [vmem:[%s297_s13] sm:$0xff]  ;;  %v456_v9 = vld [vmem:[#allocation8 + $0x58] sm:$0xff]  ;;  %v455_v10 = vld [vmem:[#allocation8 + $0x50] sm:$0xff]  ;;  %s1472_s13 = scalar_lea.vmem [#allocation10], %s857_s14  ;;  %p1570_p5 = scmp.ne.s32.totalorder %s1556_s8, 0 }
  0x82   : > { %893 = vmatpush3.msra.mxu0 %v345_v1  ;;  %491 = vmatpush1.msra.mxu1 %v459_v5  ;;  %v340_v11 = vld [vmem:[#allocation7 + $0x8] sm:$0xff]  ;;  %v341_v13 = vld [vmem:[#allocation7 + $0x10] sm:$0xff]  ;;  %v574_v14 = vld [vmem:[%s1410_s7 + $0x38] sm:$0xff]  ;;  %s730_s14 = sshll.u32 %s1472_s13, 4  ;;  %s1182_s3 = smov [#allocation10]   ;;  %s1481_s14 = int_to_ptr.vmem [resolvable:$true] %s730_s14 }
  0x83   : > { %894 = vmatprep.subr.mxu0 %v344_v3  ;;  %492 = vmatprep.subr.mxu1 %v458_v6  ;;  %v454_v12 = vld [vmem:[#allocation8 + $0x48] sm:$0xff]  ;;  %v453_v15 = vld [vmem:[#allocation8 + $0x40] sm:$0xff]  ;;  %v573_v16 = vld [vmem:[%s1410_s7 + $0x30] sm:$0xff]  ;;  %s1094_s25 = scalar_lea.vmem %s1481_s14, 1024  ;;  %s1098_s15 = sshll.u32 %s1182_s3, 4  ;;  %s1099_s15 = int_to_ptr.vmem [resolvable:$false] %s1098_s15 }
  0x84   : > { %895 = vmatpush3.msra.mxu0 %v344_v3  ;;  %493 = vmatpush1.msra.mxu1 %v457_v7  ;;  %v452_v17 = vld [vmem:[#allocation8 + $0x38] sm:$0xff]  ;;  %v572_v18 = vld [vmem:[%s1410_s7 + $0x28] sm:$0xff]  ;;  %v451_v20 = vld [vmem:[#allocation8 + $0x30] sm:$0xff]  ;;  %p1095_p0 = scmp.ne.s32.totalorder %s1481_s14, %s1094_s25  ;;  %s1100_s16 = scalar_lea.vmem %s1099_s15, 2048 }
  0x85   : > { %896 = vmatprep.subr.mxu0 %v343_v8  ;;  %494 = vmatprep.subr.mxu1 %v456_v9  ;;  %v342_v19 = vld [vmem:[#allocation7 + $0x18] sm:$0xff]  ;;  %v571_v21 = vld [vmem:[%s1410_s7 + $0x20] sm:$0xff]  ;;  %v450_v22 = vld [vmem:[#allocation8 + $0x28] sm:$0xff]  ;;  %p1101_p9 = scmp.lt.s32.totalorder %s1481_s14, %s1099_s15  ;;  %p1102_p13 = scmp.lt.s32.totalorder %s1100_s16, %s1094_s25 }
  0x86   : > { %897 = vmatpush3.msra.mxu0 %v343_v8  ;;  %495 = vmatpush1.msra.mxu1 %v455_v10  ;;  %v570_v23 = vld [vmem:[%s1410_s7 + $0x18] sm:$0xff]  ;;  %v449_v24 = vld [vmem:[#allocation8 + $0x20] sm:$0xff]  ;;  %v569_v25 = vld [vmem:[%s1410_s7 + $0x10] sm:$0xff]  ;;  %p1096_p3 = pnand %p1095_p0, %p1570_p5 }
  0x87   : > { %899 = vmatmul.mubr.msk.f32.vlgmr.msra.gmra.mxu0 %vm347_vm0, %v340_v11  ;;  %496 = vmatprep.subr.mxu1 %v454_v12  ;;  %v448_v26 = vld [vmem:[#allocation8 + $0x18] sm:$0xff]  ;;  %v568_v27 = vld [vmem:[%s1410_s7 + $0x8] sm:$0xff]  ;;  %v447_v28 = vld [vmem:[#allocation8 + $0x10] sm:$0xff]  ;;  %p1103_p1 = por %p1102_p13, %p1101_p9 }
  0x88   : > { %901 = vmatprep.mubr.msk.f32.mxu0 %vm347_vm0, %v341_v13  ;;  %611 = vmatprep.subr.mxu0 %v574_v14  ;;  %v567_v29 = vld [vmem:[%s1410_s7] sm:$0xff]  ;;  %v446_v30 = vld [vmem:[#allocation8 + $0x8] sm:$0xff]  ;;  %v565_v35 = vld [vmem:[%s1534_s2 + $0x10] sm:$0xff]  ;;  %p1097_p11 = pneg %p1096_p3 }
  0x89   : > { %497 = vmatpush1.msra.mxu1 %v453_v15  ;;  %612 = vmatpush1.msra.mxu0 %v573_v16  ;;  %v563_v31 = vld [vmem:[%s1534_s2] sm:$0xff]  ;;  %v564_v34 = vld [vmem:[%s1534_s2 + $0x8] sm:$0xff]  ;;  %v566_v36 = vld [vmem:[%s1534_s2 + $0x18] sm:$0xff] }
  0x8a   : > { %498 = vmatprep.subr.mxu1 %v452_v17  ;;  %613 = vmatprep.subr.mxu0 %v572_v18  ;;  %v445_v33 = vld [vmem:[#allocation8] sm:$0xff]  ;;  %v678_v38 = vld [vmem:[%s1537_s5 + $0x10] sm:$0xff]  ;;  %v677_v40 = vld [vmem:[%s1537_s5 + $0x8] sm:$0xff]  ;;  %p1104_p4 = pnand %p1103_p1, %p1097_p11 }
  0x8b   : > { %902 = vmatmul.mubr.msk.f32.gmra.mxu0 %vm347_vm0, %v342_v19  ;;  %499 = vmatpush1.msra.mxu1 %v451_v20  ;;  %v676_v37 = vld [vmem:[%s1537_s5] sm:$0xff]  ;;  %v679_v41 = vld [vmem:[%s1537_s5 + $0x18] sm:$0xff] }
  0x8c   : > { %614 = vmatpush1.msra.mxu0 %v571_v21  ;;  %500 = vmatprep.subr.mxu1 %v450_v22 }
  0x8d   : > { %615 = vmatprep.subr.mxu0 %v570_v23  ;;  %501 = vmatpush1.msra.mxu1 %v449_v24 }
  0x8e   : > { %616 = vmatpush1.msra.mxu0 %v569_v25  ;;  %502 = vmatprep.subr.mxu1 %v448_v26 }
  0x8f   : > { %617 = vmatprep.subr.mxu0 %v568_v27  ;;  %503 = vmatpush1.msra.mxu1 %v447_v28 }
  0x90   : > { %618 = vmatpush1.msra.mxu0 %v567_v29  ;;  %651 = vmatprep.mubr.f32.mxu0 %v1180_v32 }
  0x91   : > { %504 = vmatprep.subr.mxu1 %v446_v30  ;;  %870 = vmatmul.mubr.msk.f32.vlgmr.msra.gmra.mxu0 %vm347_vm0, %v563_v31 }
  0x92   : > { %505 = vmatpush1.msra.mxu1 %v445_v33  ;;  %657 = vmatprep.mubr.f32.mxu0 %v1180_v32 }
  0x93   : > { %984 = vset.pattern.permute.xlu0 %v1181_v39  ;;  %985 = vset.pattern.permute.xlu1 %v1181_v39 }
  0x94   : > { %682 = vperm.xlu0 %984, %v676_v37   ;;  %692 = vperm.xlu1 %985, %v678_v38  }
  0x95   : > { %871 = vmatmul.mubr.msk.f32.gmra.mxu0 %vm347_vm0, %v564_v34 }
  0x96   : > { %663 = vmatprep.mubr.f32.mxu0 %v1180_v32 }
  0x98   : > { %687 = vperm.xlu0 %984, %v677_v40   ;;  %697 = vperm.xlu1 %985, %v679_v41  }
  0x99   : > { %872 = vmatmul.mubr.msk.f32.gmra.mxu0 %vm347_vm0, %v565_v35 }
  0x9a   : > { %669 = vmatprep.mubr.f32.mxu0 %v1180_v32 }
  0x9d   : > { %873 = vmatmul.mubr.msk.f32.gmra.mxu0 %vm347_vm0, %v566_v36 }
 0x10f   : > { %v683_v49 = vpop.permute.xlu0 %682  ;;  %v693_v1 = vpop.permute.xlu1 %692 }
 0x113   : > { %v688_v58 = vpop.permute.xlu0 %687  ;;  %v698_v11 = vpop.permute.xlu1 %697 }
 0x147   : > { %v900_v42 = vpop.f32.mrf.mxu0 }
 0x149   : > { %v426_v43 = vpop.f32.mrf.mxu0 }
 0x14a   : > { %866 = vmatmul.mubr.msk.f32.vlgmr.msra.gmra.mxu1 %vm461_vm1, %v426_v43 }
 0x14b   : > { %544 = vmatprep.mubr.f32.mxu1 %v1180_v32  ;;  %v903_v44 = vpop.f32.mrf.mxu0 }
 0x14d   : > { %v436_v45 = vpop.f32.mrf.mxu0 }
 0x14e   : > { %867 = vmatmul.mubr.msk.f32.gmra.mxu1 %vm461_vm1, %v900_v42 }
 0x14f   : > { %550 = vmatprep.mubr.f32.mxu1 %v1180_v32 }
 0x151   : > { %v653_v46 = vpop.f32.mrf.mxu0 }
 0x152   : > { %868 = vmatmul.mubr.msk.f32.gmra.mxu1 %vm461_vm1, %v436_v45 }
 0x153   : > { %556 = vmatprep.mubr.f32.mxu1 %v1180_v32  ;;  %v655_v47 = vpop.f32.mrf.mxu0 }
 0x155   : > { %v659_v48 = vpop.f32.mrf.mxu0 }
 0x156   : > { %869 = vmatmul.mubr.msk.f32.gmra.mxu1 %vm461_vm1, %v903_v44 }
 0x157   : > { %v661_v50 = vpop.f32.mrf.mxu0 }
 0x159   : > { %v665_v54 = vpop.f32.mrf.mxu0 }
 0x15b   : > { %v667_v62 = vpop.f32.mrf.mxu0 }
 0x15d   : > { %v671_v6 = vpop.f32.mrf.mxu0 }
 0x15f   : > { %v673_v13 = vpop.f32.mrf.mxu0 }
 0x20a   : > { %v540_v51 = vpop.f32.mrf.mxu1 }
 0x20b   : > { %v654_v52 = vadd.f32 %v653_v46, %v540_v51 }
 0x20c   : > { %v542_v53 = vpop.f32.mrf.mxu1 }
 0x20d   : > { %v700_v55 = vadd.f32 %v683_v49, %v654_v52  ;;  %v656_v56 = vadd.f32 %v655_v47, %v542_v53 }
 0x20e   : > { %v546_v57 = vpop.f32.mrf.mxu1 }
 0x20f   : > { %708 = vst [vmem:[%s1472_s13] sm:$0xff] %v700_v55  ;;  %v701_v59 = vadd.f32 %v683_v49, %v656_v56  ;;  %v660_v60 = vadd.f32 %v659_v48, %v546_v57 }
 0x210   : > { %v548_v61 = vpop.f32.mrf.mxu1 }
 0x211   : > { %709 = vst [vmem:[%s1472_s13 + $0x8] sm:$0xff] %v701_v59  ;;  %v702_v63 = vadd.f32 %v688_v58, %v660_v60  ;;  %v662_v0 = vadd.f32 %v661_v50, %v548_v61 }
 0x212   : > { %v552_v2 = vpop.f32.mrf.mxu1 }
 0x213   : > { %710 = vst [vmem:[%s1472_s13 + $0x10] sm:$0xff] %v702_v63  ;;  %v703_v3 = vadd.f32 %v688_v58, %v662_v0  ;;  %v666_v4 = vadd.f32 %v665_v54, %v552_v2 }
 0x214   : > { %v554_v5 = vpop.f32.mrf.mxu1 }
 0x215   : > { %711 = vst [vmem:[%s1472_s13 + $0x18] sm:$0xff] %v703_v3  ;;  %v704_v7 = vadd.f32 %v693_v1, %v666_v4  ;;  %v668_v8 = vadd.f32 %v667_v62, %v554_v5 }
 0x216   : > { %v558_v9 = vpop.f32.mrf.mxu1 }
 0x217   : > { %712 = vst [vmem:[%s1472_s13 + $0x20] sm:$0xff] %v704_v7  ;;  %v705_v10 = vadd.f32 %v693_v1, %v668_v8  ;;  %v672_v12 = vadd.f32 %v671_v6, %v558_v9 }
 0x218   : > { %v560_v14 = vpop.f32.mrf.mxu1 }
 0x219   : > { %713 = vst [vmem:[%s1472_s13 + $0x28] sm:$0xff] %v705_v10  ;;  %v706_v15 = vadd.f32 %v698_v11, %v672_v12  ;;  %v674_v16 = vadd.f32 %v673_v13, %v560_v14 }
 0x21b   : > { %714 = vst [vmem:[%s1472_s13 + $0x30] sm:$0xff] %v706_v15  ;;  %v707_v17 = vadd.f32 %v698_v11, %v674_v16 }
 0x21d   : > { %715 = vst [vmem:[%s1472_s13 + $0x38] sm:$0xff] %v707_v17 }
 0x21e   : > { %1107 = shalt.err (!%p1104_p4)
}
 0x21f   : > { %s1108_s20 = scalar_lea.hbm %s1487_s11, 1024  ;;  %s1112_s17 = scalar_lea.hbm %s1538_s6, 2048 }
 0x220   : > { %p1109_p10 = scmp.ne.s32.totalorder %s1487_s11, %s1108_s20  ;;  %p1113_p2 = scmp.lt.s32.totalorder %s1487_s11, %s1538_s6 }
 0x221   : > { %p1114_p6 = scmp.lt.s32.totalorder %s1112_s17, %s1108_s20 }
 0x222   : > { %p1110_p7 = pnand %p1109_p10, %p1570_p5 }
 0x223   : > { %p1115_p12 = por %p1114_p6, %p1113_p2 }
 0x224   : > { %p1111_p8 = pneg %p1110_p7 }
 0x226   : > { %p1116_p0 = pnand %p1115_p12, %p1111_p8 }
 0x228   : > { %1119 = shalt.err (!%p1116_p0)
}
 0x229   : > { %s1183_s4 = smov 256   ;;  %s1184_s29 = smov 16  }
 0x22a   : > { %916 = dma.vmem_to_hbm [thread:$0]  (%p1570_p5), %s1481_s14, 1024, %s1487_s11, %s717_s18, %s1183_s4, %s1183_s4, %s1184_s29  }
 0x22b PF: > { %s745_s13 = sand.u32 1, %s1158_s21   ;;  %p1571_p3 = scmp.ne.s32.totalorder %s1550_s28, 0 }
 0x22c   : > { %p1572_p11 = scmp.ge.s32.totalorder %s1170_s24, 2  ;;  %s746_s27 = scalar_lea.sflag [#allocation4], %s745_s13 }
 0x22e   : > { %p933_p9 = pnand %p1572_p11, %p1571_p3 }
 0x230   : > { %p934_p13 = pneg %p933_p9 }
 0x232   : > { %1153 = dma.done.wait (%p934_p13), %s746_s27, 1024  }
 0x233   : > { %1155 = vsyncadd (%p934_p13), %s746_s27, 4294966272  ;;  %s1573_s19 = sld [smem:[#allocation16_spill]]  ;;  %p23_p1 = scmp.ge.s32.totalorder %s1298_s26, 4  }
 0x234   : > { %s1574_s21 = smov %s1162_s22  ;;  %s1575_s22 = smov %s1166_s23 }
 0x235   : > { %s1577_s24 = smov %s1298_s26  ;;  %25 = sbr.rel (!%p23_p1) target bundleno = 12 (0xc), region = 110 }
 0x239   : > { %s1576_s23 = smov %s1573_s19 }
 0x23a   :  { %751 = vsyncpa [#allocation3], 1 }
 0x23b   :  { %753 = vsyncpa [#allocation3 + $0x1], 1 }
 0x23c   :  { %754 = vsyncpa [#allocation6], 1 }
 0x23d   :  { %756 = vsyncpa [#allocation6 + $0x1], 1 }
 0x23e   :  { %757 = vsyncpa [#allocation9], 1 }
 0x23f   :  { %758 = vsyncpa [#allocation4], 1 }
 0x240   :  { %760 = vsyncpa [#allocation4 + $0x1], 1 }

</bundles_post_ra>
